<compile_context>
chip_gen: v6e
topology: v6e:2x2x1
jax: 0.10.0
libtpu: 0.0.40
codegen_flags: <defaults>
</compile_context>

<pallas_src>
import jax
import jax.numpy as jnp
import numpy as np
from jax.experimental import pallas as pl
from jax.experimental.pallas import tpu as pltpu


def _sigmoid_via_tanh(z):
    # sigmoid(z) == 0.5 * (1 + tanh(z / 2)): a single EUP op instead of exp + recip.
    return 0.5 * jnp.tanh(0.5 * z) + 0.5


# ----------------------------------------------------------------------------
# Kernel 1: single-layer LSTM over time chunks (the LSTMRNN forward).
# ----------------------------------------------------------------------------
def lstm_chunk_kernel(x_ref, h0_ref, c0_ref, wih_ref, whh_ref, b_ref,
                      hseq_ref, hn_ref, cn_ref,
                      h_sc, c_sc, g_sc, hseq_sc):
    c_idx = pl.program_id(1)                       # time-chunk index (innermost, sequential)

    # (Re)load the initial state at the start of each batch block's time sweep.
    @pl.when(c_idx == 0)
    def _():
        h_sc[...] = h0_ref[...].astype(jnp.float32)
        c_sc[...] = c0_ref[...].astype(jnp.float32)

    Bt, Lt, E = x_ref.shape                        # batch-major x chunk
    H = h_sc.shape[-1]
    mm_dt = whh_ref.dtype                          # bf16 on v6e/v7x, f32 otherwise

    # --- Phase 1: hoisted input projection for the whole chunk.
    # Relayout the chunk to time-major in f32 (XLU, once per chunk), then one
    # (Lt*Bt, E) x (E, 4H) MXU matmul instead of Lt tiny ones.
    x_tm = pltpu.einshape("bte->tbe", x_ref[...].astype(jnp.float32))   # (Lt, Bt, E)
    x2 = x_tm.reshape(Lt * Bt, E).astype(mm_dt)
    g2 = jnp.dot(x2, wih_ref[...], preferred_element_type=jnp.float32) + b_ref[...]
    g_sc[...] = g2.reshape(Lt, Bt, 4 * H)          # time-major gate buffer (f32)

    # --- Phase 2: the recurrence.  h/c are fori_loop carries (vregs); the only
    # per-step work is dot(h, W_hh) + gate math.  Gate order: i, f, g, o.
    def step(t, carry):
        h, c = carry
        gates = g_sc[t] + jnp.dot(h.astype(mm_dt), whh_ref[...],
                                  preferred_element_type=jnp.float32)   # (Bt, 4H)
        i_f = _sigmoid_via_tanh(gates[:, 0:2 * H])     # i | f in one contiguous EUP sweep
        i = i_f[:, 0:H]
        f = i_f[:, H:2 * H]
        g = jnp.tanh(gates[:, 2 * H:3 * H])
        o = _sigmoid_via_tanh(gates[:, 3 * H:4 * H])
        c_new = f * c + i * g                          # elementwise kept in f32 (v5e)
        h_new = o * jnp.tanh(c_new)
        hseq_sc[t] = h_new                             # time-major f32 staging store
        return h_new, c_new

    h_fin, c_fin = jax.lax.fori_loop(0, Lt, step, (h_sc[...], c_sc[...]),
                                     unroll=min(Lt, 8))

    # Persist carry for the next chunk (one store per chunk, not per step).
    h_sc[...] = h_fin
    c_sc[...] = c_fin

    # One XLU relayout per chunk -> lane-dense batch-major output store.
    hseq_ref[...] = pltpu.einshape("tbh->bth", hseq_sc[...]).astype(hseq_ref.dtype)

    # --- Final state: write once, on the last time chunk only.
    @pl.when(c_idx == pl.num_programs(1) - 1)
    def _():
        hn_ref[...] = h_fin.astype(hn_ref.dtype)
        cn_ref[...] = c_fin.astype(cn_ref.dtype)


def lstm_forward(x, init_state, w_ih, w_hh, b, *,
                 block_t=None, block_b=None, matmul_dtype=jnp.bfloat16):
    """x: [B, L, E] (batch-major); init_state: (h0, c0) each [B, H].
    Returns (h_seq [B, L, H], (h_n, c_n)).

    matmul_dtype: dtype of the MXU operands (W_ih, W_hh and the rows fed to the
    MXU).  Default bf16 (v6e/v7x-native rate); pass jnp.float32 (or None) for
    exact-f32 matmuls.  Accumulation / bias / gate math / h,c carry stay f32.
    """
    h0, c0 = init_state
    B, L, E = x.shape
    H = h0.shape[-1]

    if block_t is None:
        block_t = min(L, 64)       # sweep 32-128 for real shapes, subject to VMEM
    if block_b is None:
        # Keep the whole batch on one core: the recurrence is latency-bound, so
        # only shard batch across v7x cores (block_b < B) when each core still
        # gets ~>=16-64 rows of real work.
        block_b = B
    assert L % block_t == 0 and B % block_b == 0, "pad L / B to the block grid"

    if matmul_dtype is not None:
        w_ih = w_ih.astype(matmul_dtype)
        w_hh = w_hh.astype(matmul_dtype)
    b = b.astype(jnp.float32)

    nb = B // block_b
    nc = L // block_t
    out_dtype = h0.dtype
    out_isz = jnp.dtype(out_dtype).itemsize
    mm_isz = jnp.dtype(w_hh.dtype).itemsize

    flops = int(2 * L * B * (E + H) * 4 * H)
    transcendentals = int(5 * L * B * H)
    bytes_accessed = int(
        x.size * x.dtype.itemsize
        + w_ih.size * mm_isz + w_hh.size * mm_isz + b.size * 4
        + (L * B * H + 4 * B * H) * out_isz)

    # VMEM footprint of one grid step (inputs/outputs double-buffered) + scratch.
    vmem_need = (
        2 * block_b * block_t * E * x.dtype.itemsize          # x chunk
        + 2 * 2 * block_b * H * h0.dtype.itemsize             # h0 / c0
        + 2 * (E + H) * 4 * H * mm_isz + 2 * 4 * H * 4        # weights + bias
        + 2 * block_b * block_t * H * out_isz                 # h_seq chunk
        + 2 * 2 * block_b * H * out_isz                       # h_n / c_n
        + (2 * block_b * H + block_t * block_b * 5 * H) * 4)  # h,c,g,hseq scratch
    vmem_limit = int(min(max(2 * vmem_need, 32 << 20), 100 << 20))

    grid_spec = pltpu.PrefetchScalarGridSpec(
        num_scalar_prefetch=0,
        grid=(nb, nc),
        in_specs=[
            pl.BlockSpec((block_b, block_t, E), lambda bb, cc: (bb, cc, 0)),  # x (batch-major)
            pl.BlockSpec((block_b, H), lambda bb, cc: (bb, 0)),               # h0
            pl.BlockSpec((block_b, H), lambda bb, cc: (bb, 0)),               # c0
            # Constant-index weights/bias: DMA'd once; double-buffer copy accepted.
            pl.BlockSpec((E, 4 * H), lambda bb, cc: (0, 0)),                  # W_ih^T
            pl.BlockSpec((H, 4 * H), lambda bb, cc: (0, 0)),                  # W_hh^T
            pl.BlockSpec((1, 4 * H), lambda bb, cc: (0, 0)),                  # bias
        ],
        out_specs=[
            pl.BlockSpec((block_b, block_t, H), lambda bb, cc: (bb, cc, 0)),  # h_seq
            pl.BlockSpec((block_b, H), lambda bb, cc: (bb, 0)),               # h_n
            pl.BlockSpec((block_b, H), lambda bb, cc: (bb, 0)),               # c_n
        ],
        scratch_shapes=[
            pltpu.VMEM((block_b, H), jnp.float32),               # h carry (cross-chunk)
            pltpu.VMEM((block_b, H), jnp.float32),               # c carry (cross-chunk)
            pltpu.VMEM((block_t, block_b, 4 * H), jnp.float32),  # time-major gate buffer
            pltpu.VMEM((block_t, block_b, H), jnp.float32),      # time-major h_seq staging
        ],
    )

    h_seq, h_n, c_n = pl.pallas_call(
        lstm_chunk_kernel,
        grid_spec=grid_spec,
        out_shape=(
            jax.ShapeDtypeStruct((B, L, H), out_dtype),
            jax.ShapeDtypeStruct((B, H), out_dtype),
            jax.ShapeDtypeStruct((B, H), out_dtype),
        ),
        compiler_params=pltpu.CompilerParams(
            # Time/chunk axis must stay innermost + "arbitrary" (see header note).
            dimension_semantics=("parallel", "arbitrary"),
            vmem_limit_bytes=vmem_limit),
        cost_estimate=pl.CostEstimate(
            flops=flops, transcendentals=transcendentals,
            bytes_accessed=bytes_accessed),
    )(x, h0, c0, w_ih, w_hh, b)

    return h_seq, (h_n, c_n)


# ----------------------------------------------------------------------------
# Kernel 2: init_decoder — masked average over L (tiled), Linear(2H->2H), tanh.
# ----------------------------------------------------------------------------
def init_dec_kernel(enc_ref, mask_ref, w_ref, b_ref, out_ref, sum_sc, cnt_sc):
    li = pl.program_id(1)                          # L-chunk index (innermost, sequential)

    @pl.when(li == 0)
    def _():
        sum_sc[...] = jnp.zeros_like(sum_sc)
        cnt_sc[...] = jnp.zeros_like(cnt_sc)

    mask = mask_ref[...].astype(jnp.float32)       # (Bt, Lt, 1) — lane-broadcast, no relayout
    enc = enc_ref[...].astype(jnp.float32)         # (Bt, Lt, 2H)
    sum_sc[...] += jnp.sum(enc * mask, axis=1)     # running masked sum (Bt, 2H)
    cnt_sc[...] += jnp.sum(mask, axis=1)           # running lengths    (Bt, 1)

    @pl.when(li == pl.num_programs(1) - 1)
    def _():
        avg = sum_sc[...] / jnp.maximum(cnt_sc[...], 1.0)     # guarded masked mean
        y = jnp.dot(avg, w_ref[...], preferred_element_type=jnp.float32) + b_ref[...]
        out_ref[...] = jnp.tanh(y).astype(out_ref.dtype)


def init_decoder(enc_hiddens, enc_mask, w_init, b_init, *, block_b=None, block_l=None):
    """enc_hiddens: [B, L, 2H]; enc_mask: [B, L] -> (h0, c0) each [B, H]."""
    B, L, H2 = enc_hiddens.shape
    H = H2 // 2
    if block_b is None:
        block_b = min(B, 32)
    if block_l is None:
        block_l = min(L, 128)
    assert B % block_b == 0 and L % block_l == 0, "pad B / L to the block grid"
    nb, nl = B // block_b, L // block_l
    # Mask shipped as [B, L, 1] so its lane axis matches enc_hiddens (no relayout).
    # TODO(synk): the size-1 lane dim pads to 128 lanes in VMEM; pack the mask or
    # fold the length precompute into scalar prefetch if this ever matters.
    mask3 = enc_mask.astype(enc_hiddens.dtype).reshape(B, L, 1)
    isz = enc_hiddens.dtype.itemsize

    vmem_need = (2 * block_b * block_l * H2 * isz          # enc block
                 + 2 * block_b * block_l * 128 * isz       # mask block (lane-padded)
                 + 2 * H2 * H2 * w_init.dtype.itemsize + 2 * H2 * 4
                 + 2 * block_b * H2 * isz
                 + (block_b * H2 + block_b) * 4)           # scratch
    vmem_limit = int(min(max(2 * vmem_need, 32 << 20), 100 << 20))

    out = pl.pallas_call(
        init_dec_kernel,
        grid_spec=pltpu.PrefetchScalarGridSpec(
            num_scalar_prefetch=0,
            grid=(nb, nl),
            in_specs=[
                pl.BlockSpec((block_b, block_l, H2), lambda i, l: (i, l, 0)),
                pl.BlockSpec((block_b, block_l, 1), lambda i, l: (i, l, 0)),
                pl.BlockSpec((H2, H2), lambda i, l: (0, 0)),
                pl.BlockSpec((1, H2), lambda i, l: (0, 0)),
            ],
            out_specs=pl.BlockSpec((block_b, H2), lambda i, l: (i, 0)),
            scratch_shapes=[
                pltpu.VMEM((block_b, H2), jnp.float32),     # running masked sum
                pltpu.VMEM((block_b, 1), jnp.float32),      # running lengths
            ],
        ),
        out_shape=jax.ShapeDtypeStruct((B, H2), enc_hiddens.dtype),
        compiler_params=pltpu.CompilerParams(
            dimension_semantics=("parallel", "arbitrary"),
            vmem_limit_bytes=vmem_limit),
    )(enc_hiddens, mask3, w_init, b_init)
    return out[:, :H], out[:, H:]                           # torch.chunk(.., 2, -1)


# ----------------------------------------------------------------------------
# Pure-JAX references (for correctness checks).
# ----------------------------------------------------------------------------
def lstm_ref(x, init_state, w_ih, w_hh, b):
    h, c = init_state
    H = h.shape[-1]
    outs = []
    for t in range(x.shape[1]):
        gates = x[:, t, :] @ w_ih + h @ w_hh + b[0]
        i = jax.nn.sigmoid(gates[:, 0 * H:1 * H])
        f = jax.nn.sigmoid(gates[:, 1 * H:2 * H])
        g = jnp.tanh(gates[:, 2 * H:3 * H])
        o = jax.nn.sigmoid(gates[:, 3 * H:4 * H])
        c = f * c + i * g
        h = o * jnp.tanh(c)
        outs.append(h)
    return jnp.stack(outs, axis=1), (h, c)


def init_decoder_ref(enc_hiddens, enc_mask, w_init, b_init):
    m = enc_mask.astype(jnp.float32)
    lens = jnp.maximum(m.sum(-1), 1.0)
    avg = (enc_hiddens * m[:, :, None]).sum(1) / lens[:, None]
    y = jnp.tanh(avg @ w_init + b_init[0])
    H = y.shape[-1] // 2
    return y[:, :H], y[:, H:]


# ----------------------------------------------------------------------------
if __name__ == "__main__":
    # Lane/sublane-aligned small shapes: B multiple of 8, H multiple of 128 so
    # gate slices (4H=512) and h stores are full-lane, unmasked.
    B, L, E, H = 8, 32, 64, 128
    key = jax.random.PRNGKey(0)
    k = jax.random.split(key, 8)

    # Deterministic parameters (shapes from the PyTorch module's __init__).
    w_ih = 0.1 * jax.random.normal(k[0], (E, 4 * H), jnp.float32)        # LSTM W_ih^T
    w_hh = 0.1 * jax.random.normal(k[1], (H, 4 * H), jnp.float32)        # LSTM W_hh^T
    b_lstm = 0.1 * jax.random.normal(k[2], (1, 4 * H), jnp.float32)      # b_ih + b_hh
    w_init = 0.1 * jax.random.normal(k[3], (2 * H, 2 * H), jnp.float32)  # Linear W^T
    b_init = 0.1 * jax.random.normal(k[4], (1, 2 * H), jnp.float32)

    # Inputs.
    x = jax.random.normal(k[5], (B, L, E), jnp.float32)                  # [bsz, L, embed]
    enc_hiddens = jax.random.normal(k[6], (B, L, 2 * H), jnp.float32)    # [bsz, L, 2*hidden]
    enc_len = np.array([32, 20, 9, 5, 17, 4, 3, 8], dtype=np.int32)
    enc_mask = jnp.asarray(
        (np.arange(L)[None, :] < enc_len[:, None]).astype(np.float32))   # [bsz, L]

    # init_decoder (L-tiled reduction exercised with block_l=8 -> 4 chunks).
    h0, c0 = init_decoder(enc_hiddens, enc_mask, w_init, b_init, block_l=8)

    # Exact-f32 MXU path; small chunks (block_t=8 -> 4 chunks) exercise the
    # cross-chunk h/c carry and the final-state gating.
    dec_states, (h_n, c_n) = lstm_forward(x, (h0, c0), w_ih, w_hh, b_lstm,
                                          matmul_dtype=jnp.float32, block_t=8)
    jax.block_until_ready((h0, c0, dec_states, h_n, c_n))

    # References (full-f32 matmuls so the comparison isolates kernel error).
    with jax.default_matmul_precision("highest"):
        h0_r, c0_r = init_decoder_ref(enc_hiddens, enc_mask, w_init, b_init)
        ref_seq, (ref_h, ref_c) = lstm_ref(x, (h0_r, c0_r), w_ih, w_hh, b_lstm)
        ref_seq, ref_h, ref_c = map(jax.block_until_ready, (ref_seq, ref_h, ref_c))

    np.testing.assert_allclose(np.asarray(h0), np.asarray(h0_r), rtol=2e-4, atol=2e-4)
    np.testing.assert_allclose(np.asarray(c0), np.asarray(c0_r), rtol=2e-4, atol=2e-4)
    np.testing.assert_allclose(np.asarray(dec_states), np.asarray(ref_seq),
                               rtol=2e-4, atol=2e-4)
    np.testing.assert_allclose(np.asarray(h_n), np.asarray(ref_h), rtol=2e-4, atol=2e-4)
    np.testing.assert_allclose(np.asarray(c_n), np.asarray(ref_c), rtol=2e-4, atol=2e-4)

    # Default path: bf16 MXU operands (v6e/v7x-native rate), one big time chunk.
    dec_bf, (h_n_bf, c_n_bf) = lstm_forward(x, (h0, c0), w_ih, w_hh, b_lstm)
    jax.block_until_ready((dec_bf, h_n_bf, c_n_bf))
    np.testing.assert_allclose(np.asarray(dec_bf), np.asarray(ref_seq),
                               rtol=5e-2, atol=5e-2)
    np.testing.assert_allclose(np.asarray(h_n_bf), np.asarray(ref_h),
                               rtol=5e-2, atol=5e-2)

    print("KERNEL_OK")
</pallas_src>

<mosaic_0001>
module attributes {stable_mosaic.version = 11 : i64} {
  func.func @init_dec_kernel(%arg0: i32, %arg1: i32, %arg2: memref<8x8x256xf32, #tpu.memory_space<vmem>>, %arg3: memref<8x8x1xf32, #tpu.memory_space<vmem>>, %arg4: memref<256x256xf32, #tpu.memory_space<vmem>>, %arg5: memref<1x256xf32, #tpu.memory_space<vmem>>, %arg6: memref<8x256xf32, #tpu.memory_space<vmem>>, %arg7: memref<8x256xf32, #tpu.memory_space<vmem>>, %arg8: memref<8x1xf32, #tpu.memory_space<vmem>>) attributes {dimension_semantics = [#tpu.dimension_semantics<parallel>, #tpu.dimension_semantics<arbitrary>], iteration_bounds = array<i64: 1, 4>, scalar_prefetch = 0 : i64, scratch_operands = 2 : i64, tpu.core_type = #tpu.core_type<tc>, window_params = [{transform_indices = @transform_0, window_bounds = array<i64: 8, 8, 256>}, {transform_indices = @transform_1, window_bounds = array<i64: 8, 8, 1>}, {pipeline_mode = #tpu.pipeline_mode<synchronous>, transform_indices = @transform_2, window_bounds = array<i64: 256, 256>}, {pipeline_mode = #tpu.pipeline_mode<synchronous>, transform_indices = @transform_3, window_bounds = array<i64: 1, 256>}, {transform_indices = @transform_4, window_bounds = array<i64: 8, 256>}]} {
    %c0_i32 = arith.constant 0 : i32
    %0 = arith.cmpi eq, %arg1, %c0_i32 : i32
    %1 = arith.extui %0 : i1 to i32
    %c0_i32_0 = arith.constant 0 : i32
    %2 = arith.cmpi ne, %1, %c0_i32_0 : i32
    scf.if %2 {
      %cst_16 = arith.constant 0.000000e+00 : f32
      %18 = vector.broadcast %cst_16 : f32 to vector<8x256xf32>
      %c0_17 = arith.constant 0 : index
      %c0_18 = arith.constant 0 : index
      %19 = vector.load %arg7[%c0_17, %c0_18] : memref<8x256xf32, #tpu.memory_space<vmem>>, vector<8x256xf32>
      tpu.vector_store %arg7[%c0_17, %c0_18], %18 {strides = array<i32>} : memref<8x256xf32, #tpu.memory_space<vmem>>, vector<8x256xf32>,
      %cst_19 = arith.constant 0.000000e+00 : f32
      %20 = vector.broadcast %cst_19 : f32 to vector<8x1xf32>
      %c0_20 = arith.constant 0 : index
      %c0_21 = arith.constant 0 : index
      %21 = vector.load %arg8[%c0_20, %c0_21] : memref<8x1xf32, #tpu.memory_space<vmem>>, vector<8x1xf32>
      tpu.vector_store %arg8[%c0_20, %c0_21], %20 {strides = array<i32>} : memref<8x1xf32, #tpu.memory_space<vmem>>, vector<8x1xf32>,
    } else {
    }
    %c0 = arith.constant 0 : index
    %c0_1 = arith.constant 0 : index
    %c0_2 = arith.constant 0 : index
    %3 = vector.load %arg3[%c0, %c0_1, %c0_2] : memref<8x8x1xf32, #tpu.memory_space<vmem>>, vector<8x8x1xf32>
    %c0_3 = arith.constant 0 : index
    %c0_4 = arith.constant 0 : index
    %c0_5 = arith.constant 0 : index
    %4 = vector.load %arg2[%c0_3, %c0_4, %c0_5] : memref<8x8x256xf32, #tpu.memory_space<vmem>>, vector<8x8x256xf32>
    %c0_6 = arith.constant 0 : index
    %c0_7 = arith.constant 0 : index
    %5 = vector.load %arg7[%c0_6, %c0_7] : memref<8x256xf32, #tpu.memory_space<vmem>>, vector<8x256xf32>
    %6 = vector.broadcast %3 : vector<8x8x1xf32> to vector<8x8x256xf32>
    %7 = arith.mulf %4, %6 : vector<8x8x256xf32>
    %cst = arith.constant dense<0.000000e+00> : vector<8x256xf32>
    %8 = vector.multi_reduction <add>, %7, %cst [1] : vector<8x8x256xf32> to vector<8x256xf32>
    %9 = arith.addf %5, %8 : vector<8x256xf32>
    %c0_8 = arith.constant 0 : index
    %c0_9 = arith.constant 0 : index
    %10 = vector.load %arg7[%c0_8, %c0_9] : memref<8x256xf32, #tpu.memory_space<vmem>>, vector<8x256xf32>
    tpu.vector_store %arg7[%c0_8, %c0_9], %9 {strides = array<i32>} : memref<8x256xf32, #tpu.memory_space<vmem>>, vector<8x256xf32>,
    %c0_10 = arith.constant 0 : index
    %c0_11 = arith.constant 0 : index
    %11 = vector.load %arg8[%c0_10, %c0_11] : memref<8x1xf32, #tpu.memory_space<vmem>>, vector<8x1xf32>
    %cst_12 = arith.constant dense<0.000000e+00> : vector<8x1xf32>
    %12 = vector.multi_reduction <add>, %3, %cst_12 [1] : vector<8x8x1xf32> to vector<8x1xf32>
    %13 = arith.addf %11, %12 : vector<8x1xf32>
    %c0_13 = arith.constant 0 : index
    %c0_14 = arith.constant 0 : index
    %14 = vector.load %arg8[%c0_13, %c0_14] : memref<8x1xf32, #tpu.memory_space<vmem>>, vector<8x1xf32>
    tpu.vector_store %arg8[%c0_13, %c0_14], %13 {strides = array<i32>} : memref<8x1xf32, #tpu.memory_space<vmem>>, vector<8x1xf32>,
    %c3_i32 = arith.constant 3 : i32
    %15 = arith.cmpi eq, %arg1, %c3_i32 : i32
    %16 = arith.extui %15 : i1 to i32
    %c0_i32_15 = arith.constant 0 : i32
    %17 = arith.cmpi ne, %16, %c0_i32_15 : i32
    scf.if %17 {
      %c0_16 = arith.constant 0 : index
      %c0_17 = arith.constant 0 : index
      %18 = vector.load %arg7[%c0_16, %c0_17] : memref<8x256xf32, #tpu.memory_space<vmem>>, vector<8x256xf32>
      %c0_18 = arith.constant 0 : index
      %c0_19 = arith.constant 0 : index
      %19 = vector.load %arg8[%c0_18, %c0_19] : memref<8x1xf32, #tpu.memory_space<vmem>>, vector<8x1xf32>
      %cst_20 = arith.constant 1.000000e+00 : f32
      %20 = vector.broadcast %cst_20 : f32 to vector<8x1xf32>
      %21 = arith.maximumf %19, %20 : vector<8x1xf32>
      %22 = vector.broadcast %21 : vector<8x1xf32> to vector<8x256xf32>
      %23 = arith.divf %18, %22 : vector<8x256xf32>
      %c0_21 = arith.constant 0 : index
      %c0_22 = arith.constant 0 : index
      %24 = vector.load %arg4[%c0_21, %c0_22] : memref<256x256xf32, #tpu.memory_space<vmem>>, vector<256x256xf32>
      %cst_23 = arith.constant dense<0.000000e+00> : vector<8x256xf32>
      %25 = tpu.matmul %23, %24, %cst_23 {dimension_numbers = #tpu.dot_dimension_numbers<[1], [0], [0], [1], [0, 0, 1, 1], [], []>} : vector<8x256xf32>, vector<256x256xf32>, vector<8x256xf32> -> vector<8x256xf32>
      %c0_24 = arith.constant 0 : index
      %c0_25 = arith.constant 0 : index
      %26 = vector.load %arg5[%c0_24, %c0_25] : memref<1x256xf32, #tpu.memory_space<vmem>>, vector<1x256xf32>
      %27 = vector.broadcast %26 : vector<1x256xf32> to vector<8x256xf32>
      %28 = arith.addf %25, %27 : vector<8x256xf32>
      %29 = math.tanh %28 : vector<8x256xf32>
      %c0_26 = arith.constant 0 : index
      %c0_27 = arith.constant 0 : index
      %30 = vector.load %arg6[%c0_26, %c0_27] : memref<8x256xf32, #tpu.memory_space<vmem>>, vector<8x256xf32>
      tpu.vector_store %arg6[%c0_26, %c0_27], %29 {strides = array<i32>} : memref<8x256xf32, #tpu.memory_space<vmem>>, vector<8x256xf32>,
    } else {
    }
    return
  }
  func.func @transform_0(%arg0: i32, %arg1: i32) -> (i32, i32, i32) {
    %c0_i32 = arith.constant 0 : i32
    %c0_i32_0 = arith.constant 0 : i32
    return %arg0, %arg1, %c0_i32 : i32, i32, i32
  }
  func.func @transform_1(%arg0: i32, %arg1: i32) -> (i32, i32, i32) {
    %c0_i32 = arith.constant 0 : i32
    %c0_i32_0 = arith.constant 0 : i32
    return %arg0, %arg1, %c0_i32 : i32, i32, i32
  }
  func.func @transform_2(%arg0: i32, %arg1: i32) -> (i32, i32) {
    %c0_i32 = arith.constant 0 : i32
    %c0_i32_0 = arith.constant 0 : i32
    %c0_i32_1 = arith.constant 0 : i32
    return %c0_i32, %c0_i32_0 : i32, i32
  }
  func.func @transform_3(%arg0: i32, %arg1: i32) -> (i32, i32) {
    %c0_i32 = arith.constant 0 : i32
    %c0_i32_0 = arith.constant 0 : i32
    %c0_i32_1 = arith.constant 0 : i32
    return %c0_i32, %c0_i32_0 : i32, i32
  }
  func.func @transform_4(%arg0: i32, %arg1: i32) -> (i32, i32) {
    %c0_i32 = arith.constant 0 : i32
    %c0_i32_0 = arith.constant 0 : i32
    return %arg0, %c0_i32 : i32, i32
  }
}

</mosaic_0001>

<bundles_post_ra>
// kernel: tpu_custom_call.1
= control target key start
LH: loop header
LB: loop body
LE: loop exit
PB: predicated region body
PF: predicated region fallthrough
CT: control target
= control target key end

     0   :  { %9 = vsyncpa [#allocation5], 0  ;;  %s1385_s0 = inlined_call_operand.hbm [shape: f32[8,32,256], index: 0, kind: input, shape index: {}]   ;;  %s1386_s1 = inlined_call_operand.vmem [shape: f32[8,32,1], index: 1, kind: input, shape index: {}]   ;;  %s1387_s2 = inlined_call_operand.hbm [shape: f32[256,256], index: 2, kind: input, shape index: {}]   ;;  %s1388_s3 = inlined_call_operand.vmem [shape: f32[1,256], index: 3, kind: input, shape index: {}]   ;;  %s1389_s4 = inlined_call_operand.hbm [shape: f32[8,256], index: 4, kind: output, shape index: {}]  }
   0x1   :  { %11 = vsyncpa [#allocation5 + $0x1], 0 }
   0x2   :  { %12 = vsyncpa [#allocation9], 0 }
   0x3   :  { %13 = vsyncpa [#allocation6], 0  ;;  %s1184_s15 = smov 0   ;;  %s1186_s16 = smov 0  }
   0x4   :  { %s1188_s17 = smov 0   ;;  %s1190_s18 = smov 0  }
   0x5   :  { %s1192_s19 = smov 0   ;;  %s1194_s20 = smov 0  }
   0x6 LB: > { %s907_s21 = sadd.s32 4294967295, %s1146_s20   ;;  %s28_s22 = sadd.s32 1, %s1142_s19  ;;  %s1146_s20 = sphi %s1194_s20, %s19_s20   ;;  %s1142_s19 = sphi %s1192_s19, %s1401_s19   ;;  %s1138_s18 = sphi %s1190_s18, %s1400_s18   ;;  %s1134_s17 = sphi %s1188_s17, %s1399_s17   ;;  %s1130_s16 = sphi %s1186_s16, %s1398_s16   ;;  %s1126_s15 = sphi %s1184_s15, %s1397_s15  }
   0x7   : > { %p29_p0 = scmp.ge.s32.totalorder %s28_s22, 4  ;;  %s40_s23 = sadd.s32 1, %s1134_s17 }
   0x8   : > { %p47_p1 = scmp.ne.s32.totalorder %s1134_s17, %s1130_s16  ;;  %p48_p2 = scmp.eq.s32.totalorder %s1146_s20, 0 }
   0x9   : > { %s1403_s22 = smov (%p29_p0, %s28_s22), 0  ;;  %p53_p4 = scmp.ne.s32.totalorder %s1130_s16, %s1126_s15 }
   0xa   : > { %p1220_p3 = por %p48_p2, %p47_p1  ;;  %s36_s25 = ssub.s32 %s1142_s19, %s1403_s22 }
   0xb   : > { %p1229_p5 = scmp.eq.s32.totalorder %s907_s21, 0  ;;  %p38_p6 = scmp.eq.s32.totalorder %s36_s25, 0 }
   0xc   : > { %p908_p7 = scmp.ge.s32.totalorder %s1146_s20, 1  ;;  %p160_p9 = scmp.lt.s32.totalorder %s1146_s20, 5 }
   0xd   : > { %p1236_p8 = por %p1229_p5, %p53_p4  ;;  %s1148_s30 = smov [#allocation8]  }
   0xe   : > { %s1242_s28 = scalar_select %p38_p6, %s1134_s17, %s40_s23  }
   0xf   : > { %s1393_s27 = scalar_select %p1236_p8, 1, 0 }
  0x10   : > { %p1244_p10 = pnand %p908_p7, %p160_p9  ;;  %s172_s5 = sshll.u32 %s1148_s30, 4  ;;  %s173_s5 = int_to_ptr.vmem [resolvable:$true] %s172_s5 }
  0x11   : > { %s1023_s6 = scalar_lea.vmem %s173_s5, 8192  ;;  %p1031_p4 = scmp.lt.s32.totalorder %s173_s5, %s173_s5 }
  0x12   : > { %p937_p11 = pneg %p1244_p10  ;;  %p1024_p0 = scmp.ne.s32.totalorder %s173_s5, %s1023_s6 }
  0x13   : > { %p1032_p6 = scmp.lt.s32.totalorder %s1023_s6, %s1023_s6 }
  0x14   : > { %p938_p12 = pnand %p937_p11, %p1229_p5 }
  0x15   : > { %p1033_p8 = por %p1032_p6, %p1031_p4 }
  0x16   : > { %p1014_p13 = pneg %p938_p12 }
  0x18   : > { %p1026_p1 = pnand %p1024_p0, %p1014_p13 }
  0x1a   : > { %p1027_p2 = pneg %p1026_p1 }
  0x1c   : > { %p1034_p7 = pnand %p1033_p8, %p1027_p2 }
  0x1e   : > { %1037 = shalt.err (!%p1034_p7)
}
  0x1f   : > { %s1149_s7 = smov 256   ;;  %s1150_s8 = smov 16  }
  0x20   : > { %940 = dma.hbm_to_vmem [thread:$0]  (!%p938_p12), %s1387_s2, 8192, %s173_s5, [#allocation9], %s1149_s7, %s1149_s7, %s1150_s8  }
  0x21   : > { %p910_p9 = scmp.ge.s32.totalorder %s1146_s20, 4 }
  0x22   : > { %s1257_s11 = sand.u32 (!%p910_p9), 1, %s1134_s17   ;;  %s926_s12 = sshll.u32 (!%p910_p9), %s1142_s19, 8 }
  0x23   : > { %185 = sbr.rel (%p910_p9) target bundleno = 62 (0x3e), region = 24  ;;  %s911_s13 = sshll.u32 (!%p910_p9), %s1257_s11, 7 }
  0x24   : > { %s202_s23 = scalar_lea.hbm (!%p910_p9), %s1385_s0, %s926_s12  ;;  %s193_s25 = scalar_lea.vmem (!%p910_p9), [#allocation4], %s911_s13 }
  0x25   : > { %s203_s30 = sshll.u32 (!%p910_p9), %s193_s25, 4  ;;  %s190_s5 = scalar_lea.sflag (!%p910_p9), [#allocation5], %s1257_s11  ;;  %s204_s30 = int_to_ptr.vmem [resolvable:$true] %s203_s30 }
  0x26   : > { %s1050_s6 = scalar_lea.vmem (!%p910_p9), %s204_s30, 2048  ;;  %s1151_s7 = smov (!%p910_p9), [#allocation4]  }
  0x27   : > { %p1051_p8 = scmp.ne.s32.totalorder (!%p910_p9), %s204_s30, %s1050_s6  ;;  %s1054_s8 = sshll.u32 (!%p910_p9), %s1151_s7, 4  ;;  %s1055_s8 = int_to_ptr.vmem [resolvable:$false] %s1054_s8 }
  0x28   : > { %s1056_s9 = scalar_lea.vmem %s1055_s8, 4096  ;;  %p1057_p13 = scmp.lt.s32.totalorder %s204_s30, %s1055_s8 }
  0x29   : > { %p1052_p11 = pnand %p1051_p8, %p1220_p3  ;;  %p1058_p0 = scmp.lt.s32.totalorder %s1056_s9, %s1050_s6 }
  0x2b   : > { %p1053_p12 = pneg %p1052_p11  ;;  %p1059_p1 = por %p1058_p0, %p1057_p13 }
  0x2d   : > { %p1060_p2 = pnand %p1059_p1, %p1053_p12 }
  0x2f   : > { %1063 = shalt.err (!%p1060_p2)
}
  0x30   : > { %s1152_s10 = smov 1024   ;;  %s1153_s12 = smov 256  }
  0x31   : > { %s1154_s13 = smov 16   ;;  %212 = sbr.rel (!%p1220_p3) target bundleno = 62 (0x3e), region = 32 }
  0x32   : > { %929 = dma.hbm_to_vmem [thread:$0]  (%p1220_p3), %s202_s23, 2048, %s204_s30, %s190_s5, %s1152_s10, %s1153_s12, %s1154_s13  }
  0x33   : > { %s914_s14 = sshll.u32 (%p1220_p3), %s1257_s11, 6  ;;  %s915_s15 = sshll.u32 (%p1220_p3), %s1142_s19, 3 }
  0x34   : > { %s221_s6 = scalar_lea.vmem (%p1220_p3), %s1386_s1, %s915_s15  ;;  %s216_s8 = scalar_lea.vmem (%p1220_p3), [#allocation7], %s914_s14 }
  0x35   : > { %v264_v0 = vld [vmem:[%s221_s6] sm:$0xff] (%p1220_p3) }
  0x36   : > { %v266_v1 = vld [vmem:[%s221_s6 + $0x20] sm:$0xff]  ;;  %265 = vst [vmem:[%s216_s8] sm:$0xff] %v264_v0 }
  0x37   : > { %v268_v2 = vld [vmem:[%s221_s6 + $0x40] sm:$0xff]  ;;  %267 = vst [vmem:[%s216_s8 + $0x8] sm:$0xff] %v266_v1 }
  0x38   : > { %269 = vst [vmem:[%s216_s8 + $0x10] sm:$0xff] %v268_v2  ;;  %v270_v3 = vld [vmem:[%s221_s6 + $0x60] sm:$0xff] }
  0x39   : > { %v272_v4 = vld [vmem:[%s221_s6 + $0x80] sm:$0xff]  ;;  %271 = vst [vmem:[%s216_s8 + $0x18] sm:$0xff] %v270_v3 }
  0x3a   : > { %v274_v5 = vld [vmem:[%s221_s6 + $0xa0] sm:$0xff]  ;;  %273 = vst [vmem:[%s216_s8 + $0x20] sm:$0xff] %v272_v4 }
  0x3b   : > { %275 = vst [vmem:[%s216_s8 + $0x28] sm:$0xff] %v274_v5  ;;  %v276_v6 = vld [vmem:[%s221_s6 + $0xc0] sm:$0xff] }
  0x3c   : > { %v278_v7 = vld [vmem:[%s221_s6 + $0xe0] sm:$0xff]  ;;  %277 = vst [vmem:[%s216_s8 + $0x30] sm:$0xff] %v276_v6 }
  0x3d   : > { %279 = vst [vmem:[%s216_s8 + $0x38] sm:$0xff] %v278_v7 }
  0x3e PF: > { %288 = sbr.rel (%p1244_p10) target bundleno = 618 (0x26a), region = 70  ;;  %s290_s24 = sand.u32 (!%p1244_p10), 1, %s1130_s16  }
  0x3f   : > { %s917_s11 = sshll.u32 (!%p1244_p10), %s290_s24, 7  ;;  %s291_s23 = scalar_lea.sflag (!%p1244_p10), [#allocation5], %s290_s24 }
  0x40   : > { %s1279_s30 = scalar_lea.vmem (!%p1244_p10), [#allocation4], %s917_s11  ;;  %p1395_p3 = scmp.ne.s32.totalorder (!%p1244_p10), %s1393_s27, 0 }
  0x43   : > { %1113 = dma.done.wait (%p1395_p3), %s291_s23, 2048  }
  0x44   : > { %1115 = vsyncadd (%p1395_p3), %s291_s23, 4294965248  ;;  %s918_s5 = sshll.u32 %s290_s24, 6 }
  0x45   : > { %s1285_s9 = scalar_lea.vmem [#allocation7], %s918_s5 }
  0x46   : > { %1117 = dma.done.wait (%p1229_p5), [#allocation9], 8192  }
  0x47   : > { %1119 = vsyncadd (%p1229_p5), [#allocation9], 4294959104  ;;  %p920_p10 = scmp.ne.s32.totalorder %s1138_s18, 0 }
  0x49   : > { %334 = sbr.rel (%p920_p10) target bundleno = 81 (0x51), region = 86 }
  0x4e   : > { %vm337_vm0 = vcmask 7168   ;;  %v1155_v8 = vmov 0.0  }
  0x4f   : > { %335 = vst [vmem:[#allocation2] sm:$0xff] %v1155_v8  ;;  %336 = vst [vmem:[#allocation2 + $0x8] sm:$0xff] %v1155_v8 }
  0x50   : > { %338 = vst.msk [vmem:[#allocation3] sm:$0xff] %vm337_vm0, %v1155_v8 }
  0x51 PF: > { %v341_v9 = vld [vmem:[%s1285_s9 + $0x10] sm:$0xff]  ;;  %vm561_vm1 = vcmask 7168   ;;  %v339_v10 = vld [vmem:[%s1285_s9] sm:$0xff]  ;;  %v342_v11 = vld [vmem:[%s1285_s9 + $0x18] sm:$0xff]  ;;  %v1156_v12 = vmov 0   ;;  %vm533_vm2 = vcmask 1041409  }
  0x52   : > { %1004 = vset.pattern.permute.xlu1 %v1156_v12  ;;  %1003 = vset.pattern.permute.xlu0 %v1156_v12  ;;  %v576_v13 = vsel %vm561_vm1, %v341_v9, 0.0  ;;  %v562_v14 = vsel %vm561_vm1, %v339_v10, 0.0  ;;  %v583_v15 = vsel %vm561_vm1, %v342_v11, 0.0  ;;  %v340_v16 = vld [vmem:[%s1285_s9 + $0x8] sm:$0xff]  ;;  %v343_v28 = vld [vmem:[%s1285_s9 + $0x20] sm:$0xff]  ;;  %v346_v29 = vld [vmem:[%s1285_s9 + $0x38] sm:$0xff] }
  0x53   : > { %377 = vperm.xlu1 %1004, %v341_v9   ;;  %v577_v17 = vrot.slane %v576_v13, 4  ;;  %367 = vperm.xlu0 %1003, %v339_v10   ;;  %v563_v18 = vrot.slane %v562_v14, 4  ;;  %v584_v19 = vrot.slane %v583_v15, 4  ;;  %v569_v20 = vsel %vm561_vm1, %v340_v16, 0.0  ;;  %v344_v21 = vld [vmem:[%s1285_s9 + $0x28] sm:$0xff]  ;;  %v345_v51 = vld [vmem:[%s1285_s9 + $0x30] sm:$0xff] }
  0x54   : > { %v570_v22 = vrot.slane %v569_v20, 4  ;;  %v597_v23 = vsel %vm561_vm1, %v344_v21, 0.0  ;;  %v590_v31 = vsel %vm561_vm1, %v343_v28, 0.0  ;;  %v611_v32 = vsel %vm561_vm1, %v346_v29, 0.0  ;;  %p921_p5 = scmp.ne.s32.totalorder %s1138_s18, 3 }
  0x55   : > { %v578_v24 = vadd.f32 %v577_v17, %v576_v13  ;;  %v564_v25 = vadd.f32 %v563_v18, %v562_v14  ;;  %v585_v26 = vadd.f32 %v584_v19, %v583_v15  ;;  %v598_v27 = vrot.slane %v597_v23, 4  ;;  %v351_v19 = vld [vmem:[%s1279_s30 + $0x20] sm:$0xff] }
  0x56   : > { %v571_v30 = vadd.f32 %v570_v22, %v569_v20  ;;  %v591_v38 = vrot.slane %v590_v31, 4  ;;  %v612_v39 = vrot.slane %v611_v32, 4  ;;  %v604_v55 = vsel %vm561_vm1, %v345_v51, 0.0  ;;  %v352_v20 = vld [vmem:[%s1279_s30 + $0x28] sm:$0xff] }
  0x57   : > { %v579_v33 = vrot.slane %v578_v24, 2  ;;  %v565_v34 = vrot.slane %v564_v25, 2  ;;  %v586_v35 = vrot.slane %v585_v26, 2  ;;  %382 = vperm.xlu1 %1004, %v342_v11   ;;  %372 = vperm.xlu0 %1003, %v340_v16   ;;  %v599_v36 = vadd.f32 %v598_v27, %v597_v23  ;;  %v560_v15 = vld [vmem:[#allocation3] sm:$0xff]  ;;  %v348_v22 = vld [vmem:[%s1279_s30 + $0x8] sm:$0xff] }
  0x58   : > { %v572_v37 = vrot.slane %v571_v30, 2  ;;  %v592_v45 = vadd.f32 %v591_v38, %v590_v31  ;;  %v613_v46 = vadd.f32 %v612_v39, %v611_v32  ;;  %v605_v61 = vrot.slane %v604_v55, 4 }
  0x59   : > { %v580_v40 = vadd.f32 %v579_v33, %v578_v24  ;;  %v566_v41 = vadd.f32 %v565_v34, %v564_v25  ;;  %v587_v42 = vadd.f32 %v586_v35, %v585_v26  ;;  %v600_v43 = vrot.slane %v599_v36, 2  ;;  %v349_v35 = vld [vmem:[%s1279_s30 + $0x10] sm:$0xff] }
  0x5a   : > { %v573_v44 = vadd.f32 %v572_v37, %v571_v30  ;;  %v593_v53 = vrot.slane %v592_v45, 2  ;;  %v614_v54 = vrot.slane %v613_v46, 2  ;;  %vm535_vm3 = vcmask 1042434   ;;  %v354_v30 = vld [vmem:[%s1279_s30 + $0x38] sm:$0xff] }
  0x5b   : > { %v581_v47 = vrot.slane %v580_v40, 1  ;;  %v567_v48 = vrot.slane %v566_v41, 1  ;;  %v588_v49 = vrot.slane %v587_v42, 1  ;;  %v601_v50 = vadd.f32 %v600_v43, %v599_v36  ;;  %392 = vperm.xlu1 %1004, %v344_v21   ;;  %387 = vperm.xlu0 %1003, %v343_v28   ;;  %v347_v21 = vld [vmem:[%s1279_s30] sm:$0xff]  ;;  %v350_v36 = vld [vmem:[%s1279_s30 + $0x18] sm:$0xff] }
  0x5c   : > { %v574_v52 = vrot.slane %v573_v44, 1  ;;  %v594_v60 = vadd.f32 %v593_v53, %v592_v45  ;;  %v615_v63 = vadd.f32 %v614_v54, %v613_v46  ;;  %v606_v2 = vadd.f32 %v605_v61, %v604_v55  ;;  %v357_v61 = vld [vmem:[%s1279_s30 + $0x50] sm:$0xff] }
  0x5d   : > { %v582_v56 = vadd.f32 %v581_v47, %v580_v40  ;;  %v568_v57 = vadd.f32 %v567_v48, %v566_v41  ;;  %v589_v58 = vadd.f32 %v588_v49, %v587_v42  ;;  %v602_v62 = vrot.slane %v601_v50, 1 }
  0x5e   : > { %v575_v59 = vadd.f32 %v574_v52, %v573_v44  ;;  %v595_v1 = vrot.slane %v594_v60, 1  ;;  %vm537_vm4 = vcmask 1043459   ;;  %v607_v6 = vrot.slane %v606_v2, 2 }
  0x5f   : > { %402 = vperm.xlu1 %1004, %v346_v29   ;;  %397 = vperm.xlu0 %1003, %v345_v51   ;;  %v603_v7 = vadd.f32 %v602_v62, %v601_v50  ;;  %vm539_vm5 = vcmask 1044484   ;;  %v616_v8 = vrot.slane %v615_v63, 1  ;;  %vm541_vm6 = vcmask 1045509   ;;  %v353_v29 = vld [vmem:[%s1279_s30 + $0x30] sm:$0xff] }
  0x60   : > { %v626_v0 = vsel %vm533_vm2, %v575_v59, %v568_v57  ;;  %v596_v4 = vadd.f32 %v595_v1, %v594_v60  ;;  %v608_v10 = vadd.f32 %v607_v6, %v606_v2  ;;  %vm543_vm7 = vcmask 1046534  }
  0x61   : > { %v627_v3 = vsel %vm535_vm3, %v582_v56, %v626_v0  ;;  %v617_v12 = vadd.f32 %v616_v8, %v615_v63  ;;  %vm545_vm8 = vcmask 1047559  }
  0x62   : > { %v628_v5 = vsel %vm537_vm4, %v589_v58, %v627_v3  ;;  %v609_v11 = vrot.slane %v608_v10, 1  ;;  %v358_v3 = vld [vmem:[%s1279_s30 + $0x58] sm:$0xff] }
  0x63   : > { %v629_v9 = vsel %vm539_vm5, %v596_v4, %v628_v5  ;;  %v355_v4 = vld [vmem:[%s1279_s30 + $0x40] sm:$0xff]  ;;  %v356_v5 = vld [vmem:[%s1279_s30 + $0x48] sm:$0xff] }
  0x64   : > { %v630_v13 = vsel %vm541_vm6, %v603_v7, %v629_v9  ;;  %v610_v14 = vadd.f32 %v609_v11, %v608_v10 }
  0x66   : > { %v631_v16 = vsel %vm543_vm7, %v610_v14, %v630_v13 }
  0x67   : > { %v632_v17 = vsel %vm545_vm8, %v617_v12, %v631_v16 }
  0x68   : > { %v634_v18 = vadd.f32 %v632_v17, %v560_v15 }
  0x6a   : > { %635 = vst.msk [vmem:[#allocation3] sm:$0xff] %vm561_vm1, %v634_v18 }
  0xce   : > { %v378_v23 = vpop.permute.xlu1 %377  ;;  %v368_v24 = vpop.permute.xlu0 %367 }
  0xcf   : > { %v409_v25 = vmul.f32 %v378_v23, %v351_v19  ;;  %v410_v26 = vmul.f32 %v378_v23, %v352_v20  ;;  %v405_v27 = vmul.f32 %v368_v24, %v347_v21  ;;  %v406_v28 = vmul.f32 %v368_v24, %v348_v22 }
  0xd1   : > { %v445_v31 = vrot.slane %v409_v25, 4  ;;  %v451_v32 = vrot.slane %v410_v26, 4  ;;  %v421_v33 = vrot.slane %v405_v27, 4  ;;  %v427_v34 = vrot.slane %v406_v28, 4 }
  0xd2   : > { %v383_v37 = vpop.permute.xlu1 %382  ;;  %v373_v38 = vpop.permute.xlu0 %372 }
  0xd3   : > { %v446_v39 = vadd.f32 %v445_v31, %v409_v25  ;;  %v452_v40 = vadd.f32 %v451_v32, %v410_v26  ;;  %v422_v41 = vadd.f32 %v421_v33, %v405_v27  ;;  %v428_v42 = vadd.f32 %v427_v34, %v406_v28  ;;  %v361_v25 = vld [vmem:[%s1279_s30 + $0x70] sm:$0xff]  ;;  %v362_v26 = vld [vmem:[%s1279_s30 + $0x78] sm:$0xff] }
  0xd4   : > { %v411_v43 = vmul.f32 %v383_v37, %v353_v29  ;;  %v412_v44 = vmul.f32 %v383_v37, %v354_v30  ;;  %v407_v45 = vmul.f32 %v373_v38, %v349_v35  ;;  %v408_v46 = vmul.f32 %v373_v38, %v350_v36 }
  0xd5   : > { %v447_v47 = vrot.slane %v446_v39, 2  ;;  %v453_v48 = vrot.slane %v452_v40, 2  ;;  %v423_v49 = vrot.slane %v422_v41, 2  ;;  %v429_v50 = vrot.slane %v428_v42, 2 }
  0xd6   : > { %v457_v51 = vrot.slane %v411_v43, 4  ;;  %v463_v52 = vrot.slane %v412_v44, 4  ;;  %v433_v53 = vrot.slane %v407_v45, 4  ;;  %v439_v54 = vrot.slane %v408_v46, 4  ;;  %v393_v62 = vpop.permute.xlu1 %392  ;;  %v388_v6 = vpop.permute.xlu0 %387 }
  0xd7   : > { %v448_v55 = vadd.f32 %v447_v47, %v446_v39  ;;  %v454_v56 = vadd.f32 %v453_v48, %v452_v40  ;;  %v424_v63 = vadd.f32 %v423_v49, %v422_v41  ;;  %v430_v0 = vadd.f32 %v429_v50, %v428_v42 }
  0xd8   : > { %v458_v57 = vadd.f32 %v457_v51, %v411_v43  ;;  %v464_v58 = vadd.f32 %v463_v52, %v412_v44  ;;  %v434_v59 = vadd.f32 %v433_v53, %v407_v45  ;;  %v440_v60 = vadd.f32 %v439_v54, %v408_v46  ;;  %v359_v44 = vld [vmem:[%s1279_s30 + $0x60] sm:$0xff]  ;;  %v360_v45 = vld [vmem:[%s1279_s30 + $0x68] sm:$0xff] }
  0xd9   : > { %v449_v7 = vrot.slane %v448_v55, 1  ;;  %v455_v8 = vrot.slane %v454_v56, 1  ;;  %v415_v13 = vmul.f32 %v393_v62, %v357_v61  ;;  %v416_v14 = vmul.f32 %v393_v62, %v358_v3 }
  0xda   : > { %v435_v1 = vrot.slane %v434_v59, 2  ;;  %v441_v2 = vrot.slane %v440_v60, 2  ;;  %v459_v9 = vrot.slane %v458_v57, 2  ;;  %v465_v10 = vrot.slane %v464_v58, 2  ;;  %v403_v27 = vpop.permute.xlu1 %402  ;;  %v398_v46 = vpop.permute.xlu0 %397 }
  0xdb   : > { %v413_v15 = vmul.f32 %v388_v6, %v355_v4  ;;  %v414_v16 = vmul.f32 %v388_v6, %v356_v5  ;;  %v425_v17 = vrot.slane %v424_v63, 1  ;;  %v431_v18 = vrot.slane %v430_v0, 1 }
  0xdc   : > { %v436_v11 = vadd.f32 %v435_v1, %v434_v59  ;;  %v442_v12 = vadd.f32 %v441_v2, %v440_v60  ;;  %v481_v21 = vrot.slane %v415_v13, 4  ;;  %v487_v22 = vrot.slane %v416_v14, 4 }
  0xdd   : > { %v469_v23 = vrot.slane %v413_v15, 4  ;;  %v475_v24 = vrot.slane %v414_v16, 4  ;;  %v460_v28 = vadd.f32 %v459_v9, %v458_v57  ;;  %v466_v29 = vadd.f32 %v465_v10, %v464_v58 }
  0xde   : > { %v437_v19 = vrot.slane %v436_v11, 1  ;;  %v443_v20 = vrot.slane %v442_v12, 1  ;;  %v482_v32 = vadd.f32 %v481_v21, %v415_v13  ;;  %v488_v33 = vadd.f32 %v487_v22, %v416_v14 }
  0xdf   : > { %v470_v34 = vadd.f32 %v469_v23, %v413_v15  ;;  %v476_v35 = vadd.f32 %v475_v24, %v414_v16  ;;  %v450_v36 = vadd.f32 %v449_v7, %v448_v55  ;;  %v456_v37 = vadd.f32 %v455_v8, %v454_v56 }
  0xe0   : > { %v438_v30 = vadd.f32 %v437_v19, %v436_v11  ;;  %v444_v31 = vadd.f32 %v443_v20, %v442_v12  ;;  %v419_v38 = vmul.f32 %v403_v27, %v361_v25  ;;  %v420_v39 = vmul.f32 %v403_v27, %v362_v26 }
  0xe1   : > { %v426_v40 = vadd.f32 %v425_v17, %v424_v63  ;;  %v432_v41 = vadd.f32 %v431_v18, %v430_v0  ;;  %v483_v42 = vrot.slane %v482_v32, 2  ;;  %v489_v43 = vrot.slane %v488_v33, 2 }
  0xe2   : > { %v461_v47 = vrot.slane %v460_v28, 1  ;;  %v467_v48 = vrot.slane %v466_v29, 1  ;;  %v471_v49 = vrot.slane %v470_v34, 2  ;;  %v477_v50 = vrot.slane %v476_v35, 2 }
  0xe3   : > { %v534_v51 = vsel %vm533_vm2, %v438_v30, %v426_v40  ;;  %v547_v52 = vsel %vm533_vm2, %v444_v31, %v432_v41  ;;  %v505_v53 = vrot.slane %v419_v38, 4  ;;  %v511_v54 = vrot.slane %v420_v39, 4 }
  0xe4   : > { %v472_v55 = vadd.f32 %v471_v49, %v470_v34  ;;  %v478_v56 = vadd.f32 %v477_v50, %v476_v35  ;;  %v417_v57 = vmul.f32 %v398_v46, %v359_v44  ;;  %v418_v58 = vmul.f32 %v398_v46, %v360_v45  ;;  %v363_v35 = vld [vmem:[#allocation2] sm:$0xff] }
  0xe5   : > { %v484_v59 = vadd.f32 %v483_v42, %v482_v32  ;;  %v490_v60 = vadd.f32 %v489_v43, %v488_v33  ;;  %v506_v61 = vadd.f32 %v505_v53, %v419_v38  ;;  %v512_v62 = vadd.f32 %v511_v54, %v420_v39 }
  0xe6   : > { %v473_v63 = vrot.slane %v472_v55, 1  ;;  %v479_v0 = vrot.slane %v478_v56, 1  ;;  %v493_v1 = vrot.slane %v417_v57, 4  ;;  %v499_v2 = vrot.slane %v418_v58, 4 }
  0xe7   : > { %v462_v3 = vadd.f32 %v461_v47, %v460_v28  ;;  %v468_v4 = vadd.f32 %v467_v48, %v466_v29  ;;  %v507_v5 = vrot.slane %v506_v61, 2  ;;  %v513_v6 = vrot.slane %v512_v62, 2 }
  0xe8   : > { %v536_v7 = vsel %vm535_vm3, %v450_v36, %v534_v51  ;;  %v548_v8 = vsel %vm535_vm3, %v456_v37, %v547_v52  ;;  %v494_v9 = vadd.f32 %v493_v1, %v417_v57  ;;  %v500_v10 = vadd.f32 %v499_v2, %v418_v58  ;;  %v364_v36 = vld [vmem:[#allocation2 + $0x8] sm:$0xff] }
  0xe9   : > { %v485_v11 = vrot.slane %v484_v59, 1  ;;  %v491_v12 = vrot.slane %v490_v60, 1  ;;  %v508_v13 = vadd.f32 %v507_v5, %v506_v61  ;;  %v514_v14 = vadd.f32 %v513_v6, %v512_v62 }
  0xea   : > { %v474_v15 = vadd.f32 %v473_v63, %v472_v55  ;;  %v480_v16 = vadd.f32 %v479_v0, %v478_v56  ;;  %v495_v17 = vrot.slane %v494_v9, 2  ;;  %v501_v18 = vrot.slane %v500_v10, 2 }
  0xeb   : > { %v538_v19 = vsel %vm537_vm4, %v462_v3, %v536_v7  ;;  %v549_v20 = vsel %vm537_vm4, %v468_v4, %v548_v8  ;;  %v509_v21 = vrot.slane %v508_v13, 1  ;;  %v515_v22 = vrot.slane %v514_v14, 1 }
  0xec   : > { %v496_v23 = vadd.f32 %v495_v17, %v494_v9  ;;  %v502_v24 = vadd.f32 %v501_v18, %v500_v10  ;;  %v486_v25 = vadd.f32 %v485_v11, %v484_v59  ;;  %v492_v26 = vadd.f32 %v491_v12, %v490_v60 }
  0xed   : > { %v540_v27 = vsel %vm539_vm5, %v474_v15, %v538_v19  ;;  %v550_v28 = vsel %vm539_vm5, %v480_v16, %v549_v20  ;;  %v510_v31 = vadd.f32 %v509_v21, %v508_v13  ;;  %v516_v32 = vadd.f32 %v515_v22, %v514_v14 }
  0xee   : > { %v497_v29 = vrot.slane %v496_v23, 1  ;;  %v503_v30 = vrot.slane %v502_v24, 1  ;;  %v542_v37 = vsel %vm541_vm6, %v486_v25, %v540_v27  ;;  %v551_v38 = vsel %vm541_vm6, %v492_v26, %v550_v28 }
  0xf0   : > { %v498_v33 = vadd.f32 %v497_v29, %v496_v23  ;;  %v504_v34 = vadd.f32 %v503_v30, %v502_v24 }
  0xf2   : > { %v544_v39 = vsel %vm543_vm7, %v498_v33, %v542_v37  ;;  %v552_v40 = vsel %vm543_vm7, %v504_v34, %v551_v38  ;;  %639 = sbr.rel (%p921_p5) target bundleno = 603 (0x25b), region = 90 }
  0xf3   : > { %v546_v41 = vsel %vm545_vm8, %v510_v31, %v544_v39  ;;  %v553_v42 = vsel %vm545_vm8, %v516_v32, %v552_v40 }
  0xf4   : > { %v556_v43 = vadd.f32 %v546_v41, %v363_v35  ;;  %v557_v44 = vadd.f32 %v553_v42, %v364_v36 }
  0xf6   : > { %558 = vst [vmem:[#allocation2] sm:$0xff] %v556_v43  ;;  %559 = vst [vmem:[#allocation2 + $0x8] sm:$0xff] %v557_v44 }
  0xf7   : > { %v642_v45 = vld [vmem:[#allocation3] sm:$0xff]  ;;  %v682_v47 = vld [vmem:[#allocation8 + $0xf0] sm:$0xff]  ;;  %v1157_v48 = vmov 0   ;;  %v681_v50 = vld [vmem:[#allocation8 + $0xe8] sm:$0xff] }
  0xf8   : > { %v683_v46 = vld [vmem:[#allocation8 + $0xf8] sm:$0xff]  ;;  %1005 = vset.pattern.permute.xlu0 %v1157_v48  ;;  %v643_v49 = vmax.f32 %v642_v45, 1.0  ;;  %v680_v51 = vld [vmem:[#allocation8 + $0xe0] sm:$0xff]  ;;  %v678_v53 = vld [vmem:[#allocation8 + $0xd0] sm:$0xff] }
  0xf9   : > { %728 = vmatprep.subr.mxu0 %v683_v46  ;;  %v679_v52 = vld [vmem:[#allocation8 + $0xd8] sm:$0xff]  ;;  %v677_v54 = vld [vmem:[#allocation8 + $0xc8] sm:$0xff]  ;;  %v676_v55 = vld [vmem:[#allocation8 + $0xc0] sm:$0xff] }
  0xfa   : > { %729 = vmatpush1.msra.mxu0 %v682_v47  ;;  %646 = vperm.xlu0 %1005, %v643_v49   ;;  %v675_v56 = vld [vmem:[#allocation8 + $0xb8] sm:$0xff]  ;;  %v674_v57 = vld [vmem:[#allocation8 + $0xb0] sm:$0xff]  ;;  %v673_v58 = vld [vmem:[#allocation8 + $0xa8] sm:$0xff] }
  0xfb   : > { %730 = vmatprep.subr.mxu0 %v681_v50  ;;  %v672_v59 = vld [vmem:[#allocation8 + $0xa0] sm:$0xff]  ;;  %v671_v60 = vld [vmem:[#allocation8 + $0x98] sm:$0xff]  ;;  %v670_v61 = vld [vmem:[#allocation8 + $0x90] sm:$0xff] }
  0xfc   : > { %731 = vmatpush1.msra.mxu0 %v680_v51  ;;  %v669_v62 = vld [vmem:[#allocation8 + $0x88] sm:$0xff]  ;;  %v668_v63 = vld [vmem:[#allocation8 + $0x80] sm:$0xff]  ;;  %v667_v0 = vld [vmem:[#allocation8 + $0x78] sm:$0xff] }
  0xfd   : > { %732 = vmatprep.subr.mxu0 %v679_v52  ;;  %v666_v1 = vld [vmem:[#allocation8 + $0x70] sm:$0xff]  ;;  %v665_v2 = vld [vmem:[#allocation8 + $0x68] sm:$0xff]  ;;  %v664_v3 = vld [vmem:[#allocation8 + $0x60] sm:$0xff] }
  0xfe   : > { %733 = vmatpush1.msra.mxu0 %v678_v53  ;;  %v663_v4 = vld [vmem:[#allocation8 + $0x58] sm:$0xff]  ;;  %v662_v5 = vld [vmem:[#allocation8 + $0x50] sm:$0xff]  ;;  %v661_v6 = vld [vmem:[#allocation8 + $0x48] sm:$0xff] }
  0xff   : > { %734 = vmatprep.subr.mxu0 %v677_v54  ;;  %v660_v7 = vld [vmem:[#allocation8 + $0x40] sm:$0xff]  ;;  %v659_v8 = vld [vmem:[#allocation8 + $0x38] sm:$0xff]  ;;  %v658_v9 = vld [vmem:[#allocation8 + $0x30] sm:$0xff]  ;;  %v718_v54 = vlaneseq }
 0x100   : > { %735 = vmatpush1.msra.mxu0 %v676_v55  ;;  %v657_v10 = vld [vmem:[#allocation8 + $0x28] sm:$0xff]  ;;  %v656_v11 = vld [vmem:[#allocation8 + $0x20] sm:$0xff]  ;;  %v655_v12 = vld [vmem:[#allocation8 + $0x18] sm:$0xff] }
 0x101   : > { %736 = vmatprep.subr.mxu0 %v675_v56  ;;  %v654_v13 = vld [vmem:[#allocation8 + $0x10] sm:$0xff]  ;;  %v653_v14 = vld [vmem:[#allocation8 + $0x8] sm:$0xff]  ;;  %v652_v15 = vld [vmem:[#allocation8] sm:$0xff]  ;;  %v719_v55 = vshrl.u32 %v718_v54, 7 }
 0x102   : > { %737 = vmatpush1.msra.mxu0 %v674_v57  ;;  %v715_v16 = vld [vmem:[#allocation8 + $0x1f8] sm:$0xff]  ;;  %v714_v17 = vld [vmem:[#allocation8 + $0x1f0] sm:$0xff]  ;;  %v713_v18 = vld [vmem:[#allocation8 + $0x1e8] sm:$0xff] }
 0x103   : > { %738 = vmatprep.subr.mxu0 %v673_v58  ;;  %v712_v19 = vld [vmem:[#allocation8 + $0x1e0] sm:$0xff]  ;;  %v711_v20 = vld [vmem:[#allocation8 + $0x1d8] sm:$0xff]  ;;  %v710_v21 = vld [vmem:[#allocation8 + $0x1d0] sm:$0xff]  ;;  %v720_v56 = vsub.s32 0, %v719_v55  ;;  %v724_v58 = vsub.s32 1, %v719_v55 }
 0x104   : > { %739 = vmatpush1.msra.mxu0 %v672_v59  ;;  %v709_v22 = vld [vmem:[#allocation8 + $0x1c8] sm:$0xff]  ;;  %v708_v23 = vld [vmem:[#allocation8 + $0x1c0] sm:$0xff]  ;;  %v707_v24 = vld [vmem:[#allocation8 + $0x1b8] sm:$0xff] }
 0x105   : > { %740 = vmatprep.subr.mxu0 %v671_v60  ;;  %v706_v25 = vld [vmem:[#allocation8 + $0x1b0] sm:$0xff]  ;;  %v705_v26 = vld [vmem:[#allocation8 + $0x1a8] sm:$0xff]  ;;  %v704_v27 = vld [vmem:[#allocation8 + $0x1a0] sm:$0xff] }
 0x106   : > { %741 = vmatpush1.msra.mxu0 %v670_v61  ;;  %v703_v28 = vld [vmem:[#allocation8 + $0x198] sm:$0xff]  ;;  %v702_v29 = vld [vmem:[#allocation8 + $0x190] sm:$0xff]  ;;  %v701_v30 = vld [vmem:[#allocation8 + $0x188] sm:$0xff] }
 0x107   : > { %742 = vmatprep.subr.mxu0 %v669_v62  ;;  %v700_v31 = vld [vmem:[#allocation8 + $0x180] sm:$0xff]  ;;  %v699_v32 = vld [vmem:[#allocation8 + $0x178] sm:$0xff]  ;;  %v698_v33 = vld [vmem:[#allocation8 + $0x170] sm:$0xff] }
 0x108   : > { %743 = vmatpush1.msra.mxu0 %v668_v63  ;;  %v697_v34 = vld [vmem:[#allocation8 + $0x168] sm:$0xff]  ;;  %v696_v35 = vld [vmem:[#allocation8 + $0x160] sm:$0xff]  ;;  %v695_v36 = vld [vmem:[#allocation8 + $0x158] sm:$0xff] }
 0x109   : > { %744 = vmatprep.subr.mxu0 %v667_v0  ;;  %v694_v37 = vld [vmem:[#allocation8 + $0x150] sm:$0xff]  ;;  %v693_v38 = vld [vmem:[#allocation8 + $0x148] sm:$0xff]  ;;  %v692_v39 = vld [vmem:[#allocation8 + $0x140] sm:$0xff] }
 0x10a   : > { %745 = vmatpush1.msra.mxu0 %v666_v1  ;;  %v691_v40 = vld [vmem:[#allocation8 + $0x138] sm:$0xff]  ;;  %v690_v41 = vld [vmem:[#allocation8 + $0x130] sm:$0xff]  ;;  %v689_v42 = vld [vmem:[#allocation8 + $0x128] sm:$0xff] }
 0x10b   : > { %746 = vmatprep.subr.mxu0 %v665_v2  ;;  %v688_v43 = vld [vmem:[#allocation8 + $0x120] sm:$0xff]  ;;  %v687_v44 = vld [vmem:[#allocation8 + $0x118] sm:$0xff]  ;;  %v686_v45 = vld [vmem:[#allocation8 + $0x110] sm:$0xff] }
 0x10c   : > { %747 = vmatpush1.msra.mxu0 %v664_v3  ;;  %v685_v46 = vld [vmem:[#allocation8 + $0x108] sm:$0xff]  ;;  %v684_v47 = vld [vmem:[#allocation8 + $0x100] sm:$0xff]  ;;  %v641_v49 = vld [vmem:[#allocation2 + $0x8] sm:$0xff] }
 0x10d   : > { %748 = vmatprep.subr.mxu0 %v663_v4  ;;  %v640_v50 = vld [vmem:[#allocation2] sm:$0xff] }
 0x10e   : > { %749 = vmatpush1.msra.mxu0 %v662_v5  ;;  %v716_v57 = vld [vmem:[%s1388_s3] sm:$0x3] }
 0x10f   : > { %750 = vmatprep.subr.mxu0 %v661_v6  ;;  %v721_v59 = vrot.slane %v716_v57, %v720_v56  ;;  %v725_v60 = vrot.slane %v716_v57, %v724_v58 }
 0x110   : > { %751 = vmatpush1.msra.mxu0 %v660_v7 }
 0x111   : > { %752 = vmatprep.subr.mxu0 %v659_v8 }
 0x112   : > { %753 = vmatpush1.msra.mxu0 %v658_v9 }
 0x113   : > { %754 = vmatprep.subr.mxu0 %v657_v10 }
 0x114   : > { %755 = vmatpush1.msra.mxu0 %v656_v11 }
 0x115   : > { %756 = vmatprep.subr.mxu0 %v655_v12 }
 0x116   : > { %757 = vmatpush1.msra.mxu0 %v654_v13 }
 0x117   : > { %758 = vmatprep.subr.mxu0 %v653_v14 }
 0x118   : > { %759 = vmatpush1.msra.mxu0 %v652_v15 }
 0x119   : > { %760 = vmatprep.subr.mxu0 %v715_v16 }
 0x11a   : > { %761 = vmatpush2.msra.mxu0 %v714_v17 }
 0x11b   : > { %762 = vmatprep.subr.mxu0 %v713_v18 }
 0x11c   : > { %763 = vmatpush2.msra.mxu0 %v712_v19 }
 0x11d   : > { %764 = vmatprep.subr.mxu0 %v711_v20 }
 0x11e   : > { %765 = vmatpush2.msra.mxu0 %v710_v21 }
 0x11f   : > { %766 = vmatprep.subr.mxu0 %v709_v22 }
 0x120   : > { %767 = vmatpush2.msra.mxu0 %v708_v23 }
 0x121   : > { %768 = vmatprep.subr.mxu0 %v707_v24 }
 0x122   : > { %769 = vmatpush2.msra.mxu0 %v706_v25 }
 0x123   : > { %770 = vmatprep.subr.mxu0 %v705_v26 }
 0x124   : > { %771 = vmatpush2.msra.mxu0 %v704_v27 }
 0x125   : > { %772 = vmatprep.subr.mxu0 %v703_v28 }
 0x126   : > { %773 = vmatpush2.msra.mxu0 %v702_v29 }
 0x127   : > { %774 = vmatprep.subr.mxu0 %v701_v30 }
 0x128   : > { %775 = vmatpush2.msra.mxu0 %v700_v31 }
 0x129   : > { %776 = vmatprep.subr.mxu0 %v699_v32 }
 0x12a   : > { %777 = vmatpush2.msra.mxu0 %v698_v33 }
 0x12b   : > { %778 = vmatprep.subr.mxu0 %v697_v34 }
 0x12c   : > { %779 = vmatpush2.msra.mxu0 %v696_v35 }
 0x12d   : > { %780 = vmatprep.subr.mxu0 %v695_v36 }
 0x12e   : > { %781 = vmatpush2.msra.mxu0 %v694_v37 }
 0x12f   : > { %782 = vmatprep.subr.mxu0 %v693_v38 }
 0x130   : > { %783 = vmatpush2.msra.mxu0 %v692_v39 }
 0x131   : > { %784 = vmatprep.subr.mxu0 %v691_v40 }
 0x132   : > { %785 = vmatpush2.msra.mxu0 %v690_v41 }
 0x133   : > { %786 = vmatprep.subr.mxu0 %v689_v42 }
 0x134   : > { %787 = vmatpush2.msra.mxu0 %v688_v43 }
 0x135   : > { %788 = vmatprep.subr.mxu0 %v687_v44 }
 0x136   : > { %789 = vmatpush2.msra.mxu0 %v686_v45 }
 0x137   : > { %790 = vmatprep.subr.mxu0 %v685_v46 }
 0x138   : > { %791 = vmatpush2.msra.mxu0 %v684_v47 }
 0x175   : > { %v647_v48 = vpop.permute.xlu0 %646 }
 0x176   : > { %1006 = vrcp.f32 %v647_v48 }
 0x183   : > { %v1007_v51 = vpop.eup %1006 }
 0x184   : > { %v651_v52 = vmul.f32 %v1007_v51, %v641_v49  ;;  %v650_v53 = vmul.f32 %v1007_v51, %v640_v50 }
 0x186   : > { %792 = vmatprep.mubr.f32.mxu0 %v651_v52 }
 0x187   : > { %793 = vmatmul.mubr.f32.vlgmr.msra.gmra.mxu0 %v650_v53 }
 0x247   : > { %v794_v61 = vpop.f32.mrf.mxu0 }
 0x248   : > { %v795_v62 = vadd.f32 %v794_v61, %v721_v59 }
 0x249   : > { %v796_v63 = vpop.f32.mrf.mxu0 }
 0x24a   : > { %1008 = vtanh.f32 %v795_v62  ;;  %v797_v0 = vadd.f32 %v796_v63, %v725_v60 }
 0x24c   : > { %1010 = vtanh.f32 %v797_v0 }
 0x257   : > { %v1009_v1 = vpop.eup %1008 }
 0x258   : > { %801 = vst [vmem:[#allocation10] sm:$0xff] %v1009_v1 }
 0x259   : > { %v1011_v2 = vpop.eup %1010 }
 0x25a   : > { %802 = vst [vmem:[#allocation10 + $0x8] sm:$0xff] %v1011_v2 }
 0x25b PF: > { %p1352_p4 = scmp.eq.s32.totalorder %s907_s21, 3  ;;  %s1158_s29 = smov [#allocation10]  }
 0x25c   : > { %s813_s10 = sshll.u32 %s1158_s29, 4  ;;  %s814_s10 = int_to_ptr.vmem [resolvable:$true] %s813_s10 }
 0x25d   : > { %s1064_s12 = scalar_lea.vmem %s814_s10, 256  ;;  %p1071_p8 = scmp.lt.s32.totalorder %s814_s10, %s814_s10 }
 0x25e   : > { %p1065_p6 = scmp.ne.s32.totalorder %s814_s10, %s1064_s12  ;;  %p1072_p11 = scmp.lt.s32.totalorder %s1064_s12, %s1064_s12 }
 0x260   : > { %p1066_p7 = pnand %p1065_p6, %p1352_p4  ;;  %p1073_p12 = por %p1072_p11, %p1071_p8 }
 0x262   : > { %p1067_p9 = pneg %p1066_p7 }
 0x264   : > { %p1074_p13 = pnand %p1073_p12, %p1067_p9 }
 0x266   : > { %1077 = shalt.err (!%p1074_p13)
}
 0x267   : > { %934 = dma.vmem_to_hbm [thread:$0]  (%p1352_p4), %s814_s10, 256, %s1389_s4, [#allocation6]  }
 0x268   : > { %1121 = dma.done.wait (%p1352_p4), [#allocation6], 256  }
 0x269   : > { %1123 = vsyncadd (%p1352_p4), [#allocation6], 4294967040 }
 0x26a PF: > { %s19_s20 = sadd.s32 1, %s1146_s20   ;;  %s1397_s15 = smov %s1130_s16 }
 0x26b   : > { %p16_p0 = scmp.ge.s32.totalorder %s19_s20, 6   ;;  %s1398_s16 = smov %s1134_s17 }
 0x26c   : > { %s1399_s17 = smov %s1242_s28  ;;  %s1400_s18 = smov %s1142_s19 }
 0x26d   : > { %s1401_s19 = smov %s1403_s22  ;;  %18 = sbr.rel (!%p16_p0) target bundleno = 6 (0x6), region = 132 }
 0x272   :  { %826 = vsyncpa [#allocation5], 1 }
 0x273   :  { %828 = vsyncpa [#allocation5 + $0x1], 1 }
 0x274   :  { %829 = vsyncpa [#allocation9], 1 }
 0x275   :  { %830 = vsyncpa [#allocation6], 1 }
 0x276   :  { %832 = vsyncpa [#allocation6 + $0x1], 1 }

</bundles_post_ra>
